<compile_context>
chip_gen: v6e
topology: v6e:2x2x1
jax: 0.10.0
libtpu: 0.0.40
codegen_flags: <defaults>
</compile_context>

<pallas_src>
import functools

import jax
import jax.numpy as jnp
from jax import lax
from jax.experimental import pallas as pl
from jax.experimental.pallas import tpu as pltpu

KSIZE = 5
PAD = 2
_OFFS = (-2, -1, 0, 1, 2)  # tap offsets relative to the center
_LANE = 128


# --------------------------------------------------------------------------- #
# Kernel
# --------------------------------------------------------------------------- #
def _dw5x5_folded_kernel(x_ref, w_ref, o_ref, *, g_blk, H, W, f, compute_dtype):
    """Depthwise 5x5 'same' conv on a lane-folded tile.

    x_ref: (g_blk, H, f*W)   input; f channels folded onto the lane axis
    w_ref: (g_blk, 25, f*W)  per-lane taps (each channel's tap repeated W times)
    o_ref: (g_blk, H, f*W)   output
    """
    CW = f * W

    # Edge-validity masks (zero padding + no cross-channel wrap on lane rolls),
    # hoisted once per grid step and shared by all groups in the block.
    col = lax.broadcasted_iota(jnp.int32, (H, CW), 1) % W   # column inside a channel
    row = lax.broadcasted_iota(jnp.int32, (H, CW), 0)
    col_ok = {d: (col < W - d) if d > 0 else (col >= -d) for d in _OFFS if d != 0}
    row_ok = {d: (row < H - d) if d > 0 else (row >= -d) for d in _OFFS if d != 0}

    def one_group(g, carry):
        x2 = x_ref[g].astype(compute_dtype)                            # (H, CW)

        # 5 column-shifted, zero-extended copies, built once per group and
        # reused for every row offset.  pltpu.roll keeps the shift on the XLU
        # rotate slot; the mask kills wrapped lanes (plane edge + channel edge)
        # so this is exactly the zero-padded window.
        xs = []
        for dw in _OFFS:
            if dw == 0:
                xs.append(x2)
            else:
                r = pltpu.roll(x2, (-dw) % CW, axis=1)
                xs.append(jnp.where(col_ok[dw], r, 0.0))

        acc = jnp.zeros((H, CW), jnp.float32)
        for ih, dh in enumerate(_OFFS):
            p = None
            for iw in range(KSIZE):
                # Per-lane tap row (1, CW): one vector multiply covers all f
                # folded channels.  Heavy mul/add chain runs in compute_dtype
                # (bf16 on v6e/v7x), the accumulator stays f32.
                wrow = w_ref[g, pl.ds(ih * KSIZE + iw, 1), :].astype(compute_dtype)
                t = xs[iw] * wrow
                p = t if p is None else p + t
            p = p.astype(jnp.float32)
            if dh != 0:
                # Row shift of the partial sum: f32 sublane rotate + edge mask.
                p = jnp.where(row_ok[dh], pltpu.roll(p, (-dh) % H, axis=0), 0.0)
            acc = acc + p
        o_ref[g] = acc.astype(o_ref.dtype)
        return carry

    lax.fori_loop(0, g_blk, one_group, 0, unroll=g_blk <= 2)


# --------------------------------------------------------------------------- #
# Reparameterization + layout helpers
# --------------------------------------------------------------------------- #
def omnishift_reparam_weight(w1x1, w3x3, w5x5, alpha):
    """Build the combined 5x5 depthwise weight: (C,1,5,5) and flat (C,25)."""
    identity = jnp.pad(jnp.ones_like(w1x1), ((0, 0), (0, 0), (PAD, PAD), (PAD, PAD)))
    p1 = jnp.pad(w1x1, ((0, 0), (0, 0), (PAD, PAD), (PAD, PAD)))
    p3 = jnp.pad(w3x3, ((0, 0), (0, 0), (1, 1), (1, 1)))
    combined = (alpha[0] * identity + alpha[1] * p1
                + alpha[2] * p3 + alpha[3] * w5x5)                    # (C, 1, 5, 5)
    w_flat = combined[:, 0, :, :].reshape(combined.shape[0], KSIZE * KSIZE)
    return combined, w_flat.astype(jnp.float32)


def _device_generation():
    try:
        kind = jax.devices()[0].device_kind.lower()
    except Exception:
        return None
    for gen in (7, 6, 5, 4, 3):
        if f"v{gen}" in kind:
            return gen
    return None


def _vmem_plan(gen):
    """(per-step VMEM budget, scoped vmem_limit_bytes), generation-aware."""
    if gen is not None and gen <= 6:
        return 88 * 2**20, 100 * 2**20      # 128 MiB parts (v4 / v5e / v6e)
    return 34 * 2**20, 48 * 2**20           # v7x-class (64 MiB / TC) or unknown


def _pick_fold(C, W, lane=_LANE):
    """Channels folded per lane row so each row is lane-dense."""
    if W >= lane:
        return 1
    divisors = [d for d in range(1, C + 1) if C % d == 0]
    for d in divisors:                      # smallest fully lane-dense fold
        if (d * W) % lane == 0:
            return d
    cands = [d for d in divisors if d * W <= 8 * lane]
    return max(cands) if cands else 1


def _pick_group_block(G, H, CW, budget_bytes, *, min_grid_steps=1, N=1):
    """Largest group tile dividing G that fits the VMEM budget and keeps the
    grid long enough for megacore sharding."""
    plane = H * CW * 4
    divisors = [d for d in range(1, G + 1) if G % d == 0]
    best = 1
    for gb in divisors:
        # 2x double-buffered input + output blocks, double-buffered weight
        # block, plus ~18 plane-sized temporaries (xs, partials, acc, masks).
        need = (4 * gb + 18) * plane + 4 * gb * KSIZE * KSIZE * CW * 4
        if need <= budget_bytes:
            best = gb
    while best > 1 and N * (G // best) < min_grid_steps:
        best = max(d for d in divisors if d < best)
    return best


def _fold(x, f):
    N, C, H, W = x.shape
    G = C // f
    if f == 1:
        return x.reshape(N, G, H, W)
    x = x.reshape(N, G, f, H, W)
    x = jnp.transpose(x, (0, 1, 3, 2, 4))
    return x.reshape(N, G, H, f * W)


def _unfold(y, f, C, H, W):
    N = y.shape[0]
    G = C // f
    if f == 1:
        return y.reshape(N, C, H, W)
    y = y.reshape(N, G, H, f, W)
    y = jnp.transpose(y, (0, 1, 3, 2, 4))
    return y.reshape(N, C, H, W)


def _fold_weights(w_flat, f, W):
    """(C, 25) -> (G, 25, f*W): per-lane taps, each channel repeated W times."""
    C = w_flat.shape[0]
    G = C // f
    w = w_flat.reshape(G, f, KSIZE * KSIZE)
    w = jnp.transpose(w, (0, 2, 1))                                   # (G, 25, f)
    return jnp.repeat(w, W, axis=-1)                                  # (G, 25, f*W)


# --------------------------------------------------------------------------- #
# Public entry point
# --------------------------------------------------------------------------- #
def omnishift_forward(x_nchw, w1x1, w3x3, w5x5, alpha, *, compute_dtype=None):
    """x_nchw: (N, C, H, W) -> (N, C, H, W).  OmniShift eval-path forward."""
    N, C, H, W = x_nchw.shape
    _, w_flat = omnishift_reparam_weight(w1x1, w3x3, w5x5, alpha)

    gen = _device_generation()
    if compute_dtype is None:
        # bf16 multiplies on v6e/v7x (f32 accumulator kept); f32 on v5e/older.
        compute_dtype = jnp.bfloat16 if (gen is not None and gen >= 6) else jnp.float32
    budget, vmem_limit = _vmem_plan(gen)

    f = _pick_fold(C, W)
    G = C // f
    CW = f * W
    min_steps = 4 if (gen is None or gen >= 7) else 1    # keep both v7x TCs busy
    g_blk = _pick_group_block(G, H, CW, budget, min_grid_steps=min_steps, N=N)

    # TODO(synk): for planes where even g_blk=1 exceeds the VMEM budget (e.g.
    # 1080p+ on v7x's 64 MiB), add an H-tile grid axis with a 2-row halo via
    # memory_space=pl.ANY + manual pltpu.make_async_copy double buffering.

    x_f = _fold(x_nchw, f)                                # (N, G, H, CW)
    w_lane = _fold_weights(w_flat, f, W)                  # (G, 25, CW)

    kernel = functools.partial(_dw5x5_folded_kernel, g_blk=g_blk, H=H, W=W, f=f,
                               compute_dtype=compute_dtype)

    y_f = pl.pallas_call(
        kernel,
        out_shape=jax.ShapeDtypeStruct((N, G, H, CW), x_nchw.dtype),
        grid_spec=pltpu.PrefetchScalarGridSpec(
            num_scalar_prefetch=0,
            grid=(N, G // g_blk),
            in_specs=[
                pl.BlockSpec((None, g_blk, H, CW), lambda n, gt: (n, gt, 0, 0)),
                pl.BlockSpec((g_blk, KSIZE * KSIZE, CW), lambda n, gt: (gt, 0, 0)),
            ],
            out_specs=pl.BlockSpec((None, g_blk, H, CW), lambda n, gt: (n, gt, 0, 0)),
        ),
        compiler_params=pltpu.CompilerParams(
            dimension_semantics=("parallel", "parallel"),
            vmem_limit_bytes=vmem_limit,
        ),
    )(x_f, w_lane)

    return _unfold(y_f, f, C, H, W)


def _reference_forward(x_nchw, w1x1, w3x3, w5x5, alpha):
    """Pure-JAX reference: reparam + depthwise 5x5 conv via lax.conv."""
    C = x_nchw.shape[1]
    combined, _ = omnishift_reparam_weight(w1x1, w3x3, w5x5, alpha)
    return lax.conv_general_dilated(
        x_nchw, combined,
        window_strides=(1, 1), padding=((PAD, PAD), (PAD, PAD)),
        dimension_numbers=("NCHW", "OIHW", "NCHW"),
        feature_group_count=C)


if __name__ == "__main__":
    N, C, H, W = 2, 48, 16, 16  # module default dim=48, small spatial size

    key = jax.random.PRNGKey(0)
    k_x, k_w1, k_w3, k_w5, k_a = jax.random.split(key, 5)

    x = jax.random.normal(k_x, (N, C, H, W), jnp.float32)
    w1x1 = jax.random.normal(k_w1, (C, 1, 1, 1), jnp.float32) * 0.1
    w3x3 = jax.random.normal(k_w3, (C, 1, 3, 3), jnp.float32) * 0.1
    w5x5 = jax.random.normal(k_w5, (C, 1, 5, 5), jnp.float32) * 0.1
    alpha = jax.random.normal(k_a, (4,), jnp.float32)

    ref = _reference_forward(x, w1x1, w3x3, w5x5, alpha)

    # 1) Exact path (f32 compute): tight tolerance validates roll/mask indexing.
    f32_fwd = jax.jit(functools.partial(omnishift_forward, compute_dtype=jnp.float32))
    out_f32 = jax.block_until_ready(f32_fwd(x, w1x1, w3x3, w5x5, alpha))
    assert out_f32.shape == (N, C, H, W)
    assert jnp.allclose(out_f32, ref, atol=1e-4, rtol=1e-4), "f32 mismatch vs reference"

    # 2) Fast path (auto dtype: bf16 multiplies on v6e/v7x, f32 elsewhere).
    fast_fwd = jax.jit(omnishift_forward)
    out_fast = jax.block_until_ready(fast_fwd(x, w1x1, w3x3, w5x5, alpha))
    gen = _device_generation()
    fast_is_bf16 = gen is not None and gen >= 6
    max_err = float(jnp.max(jnp.abs(out_fast - ref)))
    tol = 0.05 * float(jnp.max(jnp.abs(ref))) + 0.05 if fast_is_bf16 else 1e-3
    assert max_err < tol, f"fast-path mismatch vs reference: {max_err} (tol {tol})"

    print("KERNEL_OK")
</pallas_src>

<mosaic_0001>
module attributes {stable_mosaic.version = 11 : i64} {
  func.func @_dw5x5_folded_kernel(%arg0: i32, %arg1: i32, %arg2: memref<1x3x16x128xf32, #tpu.memory_space<vmem>>, %arg3: memref<3x25x128xf32, #tpu.memory_space<vmem>>, %arg4: memref<1x3x16x128xf32, #tpu.memory_space<vmem>>) attributes {dimension_semantics = [#tpu.dimension_semantics<parallel>, #tpu.dimension_semantics<parallel>], iteration_bounds = array<i64: 2, 2>, scalar_prefetch = 0 : i64, scratch_operands = 0 : i64, tpu.core_type = #tpu.core_type<tc>, window_params = [{transform_indices = @transform_0, window_bounds = array<i64: 1, 3, 16, 128>}, {transform_indices = @transform_1, window_bounds = array<i64: 3, 25, 128>}, {transform_indices = @transform_2, window_bounds = array<i64: 1, 3, 16, 128>}]} {
    %0 = tpu.iota {dimensions = array<i32: 1>} : vector<16x128xi32>
    %c16_i32 = arith.constant 16 : i32
    %c0_i32 = arith.constant 0 : i32
    %1 = arith.cmpi eq, %c16_i32, %c0_i32 : i32
    %c1_i32 = arith.constant 1 : i32
    %2 = arith.select %1, %c1_i32, %c16_i32 : i32
    %3 = vector.broadcast %2 : i32 to vector<16x128xi32>
    %4 = arith.remsi %0, %3 : vector<16x128xi32>
    %c0_i32_0 = arith.constant 0 : i32
    %5 = vector.broadcast %c0_i32_0 : i32 to vector<16x128xi32>
    %6 = arith.cmpi ne, %4, %5 : vector<16x128xi32>
    %c0_i32_1 = arith.constant 0 : i32
    %7 = vector.broadcast %c0_i32_1 : i32 to vector<16x128xi32>
    %8 = arith.cmpi slt, %4, %7 : vector<16x128xi32>
    %c0_i32_2 = arith.constant 0 : i32
    %9 = arith.cmpi slt, %2, %c0_i32_2 : i32
    %10 = vector.broadcast %9 : i1 to vector<16x128xi1>
    %11 = vector.broadcast %10 : vector<16x128xi1> to vector<16x128xi1>
    %12 = arith.xori %8, %11 : vector<16x128xi1>
    %13 = arith.andi %12, %6 : vector<16x128xi1>
    %14 = vector.broadcast %2 : i32 to vector<16x128xi32>
    %15 = arith.addi %4, %14 : vector<16x128xi32>
    %16 = arith.select %13, %15, %4 : vector<16x128xi1>, vector<16x128xi32>
    %17 = tpu.iota {dimensions = array<i32: 0>} : vector<16x128xi32>
    %c2_i32 = arith.constant 2 : i32
    %18 = vector.broadcast %c2_i32 : i32 to vector<16x128xi32>
    %19 = arith.cmpi sge, %16, %18 : vector<16x128xi32>
    %c1_i32_3 = arith.constant 1 : i32
    %20 = vector.broadcast %c1_i32_3 : i32 to vector<16x128xi32>
    %21 = arith.cmpi sge, %16, %20 : vector<16x128xi32>
    %c15_i32 = arith.constant 15 : i32
    %22 = vector.broadcast %c15_i32 : i32 to vector<16x128xi32>
    %23 = arith.cmpi slt, %16, %22 : vector<16x128xi32>
    %c14_i32 = arith.constant 14 : i32
    %24 = vector.broadcast %c14_i32 : i32 to vector<16x128xi32>
    %25 = arith.cmpi slt, %16, %24 : vector<16x128xi32>
    %c2_i32_4 = arith.constant 2 : i32
    %26 = vector.broadcast %c2_i32_4 : i32 to vector<16x128xi32>
    %27 = arith.cmpi sge, %17, %26 : vector<16x128xi32>
    %c1_i32_5 = arith.constant 1 : i32
    %28 = vector.broadcast %c1_i32_5 : i32 to vector<16x128xi32>
    %29 = arith.cmpi sge, %17, %28 : vector<16x128xi32>
    %c15_i32_6 = arith.constant 15 : i32
    %30 = vector.broadcast %c15_i32_6 : i32 to vector<16x128xi32>
    %31 = arith.cmpi slt, %17, %30 : vector<16x128xi32>
    %c14_i32_7 = arith.constant 14 : i32
    %32 = vector.broadcast %c14_i32_7 : i32 to vector<16x128xi32>
    %33 = arith.cmpi slt, %17, %32 : vector<16x128xi32>
    %c0_i32_8 = arith.constant 0 : i32
    %c3_i32 = arith.constant 3 : i32
    %34 = arith.addi %c0_i32_8, %c3_i32 : i32
    %c1_i32_9 = arith.constant 1 : i32
    scf.for %arg5 = %c0_i32_8 to %34 step %c1_i32_9  : i32 {
      %c0 = arith.constant 0 : index
      %35 = arith.index_cast %arg5 : i32 to index
      %c0_11 = arith.constant 0 : index
      %c0_12 = arith.constant 0 : index
      %36 = vector.load %arg2[%c0, %35, %c0_11, %c0_12] : memref<1x3x16x128xf32, #tpu.memory_space<vmem>>, vector<1x1x16x128xf32>
      %37 = vector.shape_cast %36 : vector<1x1x16x128xf32> to vector<16x128xf32>
      %c2_i32_13 = arith.constant 2 : i32
      %38 = tpu.dynamic_rotate %37 by %c2_i32_13 dim 1 : vector<16x128xf32>, i32 -> vector<16x128xf32>
      %cst = arith.constant 0.000000e+00 : f32
      %39 = vector.broadcast %cst : f32 to vector<16x128xf32>
      %40 = arith.select %19, %38, %39 : vector<16x128xi1>, vector<16x128xf32>
      %c1_i32_14 = arith.constant 1 : i32
      %41 = tpu.dynamic_rotate %37 by %c1_i32_14 dim 1 : vector<16x128xf32>, i32 -> vector<16x128xf32>
      %cst_15 = arith.constant 0.000000e+00 : f32
      %42 = vector.broadcast %cst_15 : f32 to vector<16x128xf32>
      %43 = arith.select %21, %41, %42 : vector<16x128xi1>, vector<16x128xf32>
      %c127_i32 = arith.constant 127 : i32
      %44 = tpu.dynamic_rotate %37 by %c127_i32 dim 1 : vector<16x128xf32>, i32 -> vector<16x128xf32>
      %cst_16 = arith.constant 0.000000e+00 : f32
      %45 = vector.broadcast %cst_16 : f32 to vector<16x128xf32>
      %46 = arith.select %23, %44, %45 : vector<16x128xi1>, vector<16x128xf32>
      %c126_i32 = arith.constant 126 : i32
      %47 = tpu.dynamic_rotate %37 by %c126_i32 dim 1 : vector<16x128xf32>, i32 -> vector<16x128xf32>
      %cst_17 = arith.constant 0.000000e+00 : f32
      %48 = vector.broadcast %cst_17 : f32 to vector<16x128xf32>
      %49 = arith.select %25, %47, %48 : vector<16x128xi1>, vector<16x128xf32>
      %cst_18 = arith.constant 0.000000e+00 : f32
      %50 = vector.broadcast %cst_18 : f32 to vector<16x128xf32>
      %51 = arith.index_cast %arg5 : i32 to index
      %c0_19 = arith.constant 0 : index
      %c0_20 = arith.constant 0 : index
      %52 = vector.load %arg3[%51, %c0_19, %c0_20] : memref<3x25x128xf32, #tpu.memory_space<vmem>>, vector<1x1x128xf32>
      %53 = vector.shape_cast %52 : vector<1x1x128xf32> to vector<1x128xf32>
      %54 = vector.broadcast %53 : vector<1x128xf32> to vector<16x128xf32>
      %55 = arith.mulf %40, %54 : vector<16x128xf32>
      %56 = arith.index_cast %arg5 : i32 to index
      %c1 = arith.constant 1 : index
      %c0_21 = arith.constant 0 : index
      %57 = vector.load %arg3[%56, %c1, %c0_21] : memref<3x25x128xf32, #tpu.memory_space<vmem>>, vector<1x1x128xf32>
      %58 = vector.shape_cast %57 : vector<1x1x128xf32> to vector<1x128xf32>
      %59 = vector.broadcast %58 : vector<1x128xf32> to vector<16x128xf32>
      %60 = arith.mulf %43, %59 : vector<16x128xf32>
      %61 = arith.addf %55, %60 : vector<16x128xf32>
      %62 = arith.index_cast %arg5 : i32 to index
      %c2 = arith.constant 2 : index
      %c0_22 = arith.constant 0 : index
      %63 = vector.load %arg3[%62, %c2, %c0_22] : memref<3x25x128xf32, #tpu.memory_space<vmem>>, vector<1x1x128xf32>
      %64 = vector.shape_cast %63 : vector<1x1x128xf32> to vector<1x128xf32>
      %65 = vector.broadcast %64 : vector<1x128xf32> to vector<16x128xf32>
      %66 = arith.mulf %37, %65 : vector<16x128xf32>
      %67 = arith.addf %61, %66 : vector<16x128xf32>
      %68 = arith.index_cast %arg5 : i32 to index
      %c3 = arith.constant 3 : index
      %c0_23 = arith.constant 0 : index
      %69 = vector.load %arg3[%68, %c3, %c0_23] : memref<3x25x128xf32, #tpu.memory_space<vmem>>, vector<1x1x128xf32>
      %70 = vector.shape_cast %69 : vector<1x1x128xf32> to vector<1x128xf32>
      %71 = vector.broadcast %70 : vector<1x128xf32> to vector<16x128xf32>
      %72 = arith.mulf %46, %71 : vector<16x128xf32>
      %73 = arith.addf %67, %72 : vector<16x128xf32>
      %74 = arith.index_cast %arg5 : i32 to index
      %c4 = arith.constant 4 : index
      %c0_24 = arith.constant 0 : index
      %75 = vector.load %arg3[%74, %c4, %c0_24] : memref<3x25x128xf32, #tpu.memory_space<vmem>>, vector<1x1x128xf32>
      %76 = vector.shape_cast %75 : vector<1x1x128xf32> to vector<1x128xf32>
      %77 = vector.broadcast %76 : vector<1x128xf32> to vector<16x128xf32>
      %78 = arith.mulf %49, %77 : vector<16x128xf32>
      %79 = arith.addf %73, %78 : vector<16x128xf32>
      %c2_i32_25 = arith.constant 2 : i32
      %80 = tpu.dynamic_rotate %79 by %c2_i32_25 dim 0 : vector<16x128xf32>, i32 -> vector<16x128xf32>
      %cst_26 = arith.constant 0.000000e+00 : f32
      %81 = vector.broadcast %cst_26 : f32 to vector<16x128xf32>
      %82 = arith.select %27, %80, %81 : vector<16x128xi1>, vector<16x128xf32>
      %83 = arith.addf %50, %82 : vector<16x128xf32>
      %84 = arith.index_cast %arg5 : i32 to index
      %c5 = arith.constant 5 : index
      %c0_27 = arith.constant 0 : index
      %85 = vector.load %arg3[%84, %c5, %c0_27] : memref<3x25x128xf32, #tpu.memory_space<vmem>>, vector<1x1x128xf32>
      %86 = vector.shape_cast %85 : vector<1x1x128xf32> to vector<1x128xf32>
      %87 = vector.broadcast %86 : vector<1x128xf32> to vector<16x128xf32>
      %88 = arith.mulf %40, %87 : vector<16x128xf32>
      %89 = arith.index_cast %arg5 : i32 to index
      %c6 = arith.constant 6 : index
      %c0_28 = arith.constant 0 : index
      %90 = vector.load %arg3[%89, %c6, %c0_28] : memref<3x25x128xf32, #tpu.memory_space<vmem>>, vector<1x1x128xf32>
      %91 = vector.shape_cast %90 : vector<1x1x128xf32> to vector<1x128xf32>
      %92 = vector.broadcast %91 : vector<1x128xf32> to vector<16x128xf32>
      %93 = arith.mulf %43, %92 : vector<16x128xf32>
      %94 = arith.addf %88, %93 : vector<16x128xf32>
      %95 = arith.index_cast %arg5 : i32 to index
      %c7 = arith.constant 7 : index
      %c0_29 = arith.constant 0 : index
      %96 = vector.load %arg3[%95, %c7, %c0_29] : memref<3x25x128xf32, #tpu.memory_space<vmem>>, vector<1x1x128xf32>
      %97 = vector.shape_cast %96 : vector<1x1x128xf32> to vector<1x128xf32>
      %98 = vector.broadcast %97 : vector<1x128xf32> to vector<16x128xf32>
      %99 = arith.mulf %37, %98 : vector<16x128xf32>
      %100 = arith.addf %94, %99 : vector<16x128xf32>
      %101 = arith.index_cast %arg5 : i32 to index
      %c8 = arith.constant 8 : index
      %c0_30 = arith.constant 0 : index
      %102 = vector.load %arg3[%101, %c8, %c0_30] : memref<3x25x128xf32, #tpu.memory_space<vmem>>, vector<1x1x128xf32>
      %103 = vector.shape_cast %102 : vector<1x1x128xf32> to vector<1x128xf32>
      %104 = vector.broadcast %103 : vector<1x128xf32> to vector<16x128xf32>
      %105 = arith.mulf %46, %104 : vector<16x128xf32>
      %106 = arith.addf %100, %105 : vector<16x128xf32>
      %107 = arith.index_cast %arg5 : i32 to index
      %c9 = arith.constant 9 : index
      %c0_31 = arith.constant 0 : index
      %108 = vector.load %arg3[%107, %c9, %c0_31] : memref<3x25x128xf32, #tpu.memory_space<vmem>>, vector<1x1x128xf32>
      %109 = vector.shape_cast %108 : vector<1x1x128xf32> to vector<1x128xf32>
      %110 = vector.broadcast %109 : vector<1x128xf32> to vector<16x128xf32>
      %111 = arith.mulf %49, %110 : vector<16x128xf32>
      %112 = arith.addf %106, %111 : vector<16x128xf32>
      %c1_i32_32 = arith.constant 1 : i32
      %113 = tpu.dynamic_rotate %112 by %c1_i32_32 dim 0 : vector<16x128xf32>, i32 -> vector<16x128xf32>
      %cst_33 = arith.constant 0.000000e+00 : f32
      %114 = vector.broadcast %cst_33 : f32 to vector<16x128xf32>
      %115 = arith.select %29, %113, %114 : vector<16x128xi1>, vector<16x128xf32>
      %116 = arith.addf %83, %115 : vector<16x128xf32>
      %117 = arith.index_cast %arg5 : i32 to index
      %c10 = arith.constant 10 : index
      %c0_34 = arith.constant 0 : index
      %118 = vector.load %arg3[%117, %c10, %c0_34] : memref<3x25x128xf32, #tpu.memory_space<vmem>>, vector<1x1x128xf32>
      %119 = vector.shape_cast %118 : vector<1x1x128xf32> to vector<1x128xf32>
      %120 = vector.broadcast %119 : vector<1x128xf32> to vector<16x128xf32>
      %121 = arith.mulf %40, %120 : vector<16x128xf32>
      %122 = arith.index_cast %arg5 : i32 to index
      %c11 = arith.constant 11 : index
      %c0_35 = arith.constant 0 : index
      %123 = vector.load %arg3[%122, %c11, %c0_35] : memref<3x25x128xf32, #tpu.memory_space<vmem>>, vector<1x1x128xf32>
      %124 = vector.shape_cast %123 : vector<1x1x128xf32> to vector<1x128xf32>
      %125 = vector.broadcast %124 : vector<1x128xf32> to vector<16x128xf32>
      %126 = arith.mulf %43, %125 : vector<16x128xf32>
      %127 = arith.addf %121, %126 : vector<16x128xf32>
      %128 = arith.index_cast %arg5 : i32 to index
      %c12 = arith.constant 12 : index
      %c0_36 = arith.constant 0 : index
      %129 = vector.load %arg3[%128, %c12, %c0_36] : memref<3x25x128xf32, #tpu.memory_space<vmem>>, vector<1x1x128xf32>
      %130 = vector.shape_cast %129 : vector<1x1x128xf32> to vector<1x128xf32>
      %131 = vector.broadcast %130 : vector<1x128xf32> to vector<16x128xf32>
      %132 = arith.mulf %37, %131 : vector<16x128xf32>
      %133 = arith.addf %127, %132 : vector<16x128xf32>
      %134 = arith.index_cast %arg5 : i32 to index
      %c13 = arith.constant 13 : index
      %c0_37 = arith.constant 0 : index
      %135 = vector.load %arg3[%134, %c13, %c0_37] : memref<3x25x128xf32, #tpu.memory_space<vmem>>, vector<1x1x128xf32>
      %136 = vector.shape_cast %135 : vector<1x1x128xf32> to vector<1x128xf32>
      %137 = vector.broadcast %136 : vector<1x128xf32> to vector<16x128xf32>
      %138 = arith.mulf %46, %137 : vector<16x128xf32>
      %139 = arith.addf %133, %138 : vector<16x128xf32>
      %140 = arith.index_cast %arg5 : i32 to index
      %c14 = arith.constant 14 : index
      %c0_38 = arith.constant 0 : index
      %141 = vector.load %arg3[%140, %c14, %c0_38] : memref<3x25x128xf32, #tpu.memory_space<vmem>>, vector<1x1x128xf32>
      %142 = vector.shape_cast %141 : vector<1x1x128xf32> to vector<1x128xf32>
      %143 = vector.broadcast %142 : vector<1x128xf32> to vector<16x128xf32>
      %144 = arith.mulf %49, %143 : vector<16x128xf32>
      %145 = arith.addf %139, %144 : vector<16x128xf32>
      %146 = arith.addf %116, %145 : vector<16x128xf32>
      %147 = arith.index_cast %arg5 : i32 to index
      %c15 = arith.constant 15 : index
      %c0_39 = arith.constant 0 : index
      %148 = vector.load %arg3[%147, %c15, %c0_39] : memref<3x25x128xf32, #tpu.memory_space<vmem>>, vector<1x1x128xf32>
      %149 = vector.shape_cast %148 : vector<1x1x128xf32> to vector<1x128xf32>
      %150 = vector.broadcast %149 : vector<1x128xf32> to vector<16x128xf32>
      %151 = arith.mulf %40, %150 : vector<16x128xf32>
      %152 = arith.index_cast %arg5 : i32 to index
      %c16 = arith.constant 16 : index
      %c0_40 = arith.constant 0 : index
      %153 = vector.load %arg3[%152, %c16, %c0_40] : memref<3x25x128xf32, #tpu.memory_space<vmem>>, vector<1x1x128xf32>
      %154 = vector.shape_cast %153 : vector<1x1x128xf32> to vector<1x128xf32>
      %155 = vector.broadcast %154 : vector<1x128xf32> to vector<16x128xf32>
      %156 = arith.mulf %43, %155 : vector<16x128xf32>
      %157 = arith.addf %151, %156 : vector<16x128xf32>
      %158 = arith.index_cast %arg5 : i32 to index
      %c17 = arith.constant 17 : index
      %c0_41 = arith.constant 0 : index
      %159 = vector.load %arg3[%158, %c17, %c0_41] : memref<3x25x128xf32, #tpu.memory_space<vmem>>, vector<1x1x128xf32>
      %160 = vector.shape_cast %159 : vector<1x1x128xf32> to vector<1x128xf32>
      %161 = vector.broadcast %160 : vector<1x128xf32> to vector<16x128xf32>
      %162 = arith.mulf %37, %161 : vector<16x128xf32>
      %163 = arith.addf %157, %162 : vector<16x128xf32>
      %164 = arith.index_cast %arg5 : i32 to index
      %c18 = arith.constant 18 : index
      %c0_42 = arith.constant 0 : index
      %165 = vector.load %arg3[%164, %c18, %c0_42] : memref<3x25x128xf32, #tpu.memory_space<vmem>>, vector<1x1x128xf32>
      %166 = vector.shape_cast %165 : vector<1x1x128xf32> to vector<1x128xf32>
      %167 = vector.broadcast %166 : vector<1x128xf32> to vector<16x128xf32>
      %168 = arith.mulf %46, %167 : vector<16x128xf32>
      %169 = arith.addf %163, %168 : vector<16x128xf32>
      %170 = arith.index_cast %arg5 : i32 to index
      %c19 = arith.constant 19 : index
      %c0_43 = arith.constant 0 : index
      %171 = vector.load %arg3[%170, %c19, %c0_43] : memref<3x25x128xf32, #tpu.memory_space<vmem>>, vector<1x1x128xf32>
      %172 = vector.shape_cast %171 : vector<1x1x128xf32> to vector<1x128xf32>
      %173 = vector.broadcast %172 : vector<1x128xf32> to vector<16x128xf32>
      %174 = arith.mulf %49, %173 : vector<16x128xf32>
      %175 = arith.addf %169, %174 : vector<16x128xf32>
      %c15_i32_44 = arith.constant 15 : i32
      %176 = tpu.dynamic_rotate %175 by %c15_i32_44 dim 0 : vector<16x128xf32>, i32 -> vector<16x128xf32>
      %cst_45 = arith.constant 0.000000e+00 : f32
      %177 = vector.broadcast %cst_45 : f32 to vector<16x128xf32>
      %178 = arith.select %31, %176, %177 : vector<16x128xi1>, vector<16x128xf32>
      %179 = arith.addf %146, %178 : vector<16x128xf32>
      %180 = arith.index_cast %arg5 : i32 to index
      %c20 = arith.constant 20 : index
      %c0_46 = arith.constant 0 : index
      %181 = vector.load %arg3[%180, %c20, %c0_46] : memref<3x25x128xf32, #tpu.memory_space<vmem>>, vector<1x1x128xf32>
      %182 = vector.shape_cast %181 : vector<1x1x128xf32> to vector<1x128xf32>
      %183 = vector.broadcast %182 : vector<1x128xf32> to vector<16x128xf32>
      %184 = arith.mulf %40, %183 : vector<16x128xf32>
      %185 = arith.index_cast %arg5 : i32 to index
      %c21 = arith.constant 21 : index
      %c0_47 = arith.constant 0 : index
      %186 = vector.load %arg3[%185, %c21, %c0_47] : memref<3x25x128xf32, #tpu.memory_space<vmem>>, vector<1x1x128xf32>
      %187 = vector.shape_cast %186 : vector<1x1x128xf32> to vector<1x128xf32>
      %188 = vector.broadcast %187 : vector<1x128xf32> to vector<16x128xf32>
      %189 = arith.mulf %43, %188 : vector<16x128xf32>
      %190 = arith.addf %184, %189 : vector<16x128xf32>
      %191 = arith.index_cast %arg5 : i32 to index
      %c22 = arith.constant 22 : index
      %c0_48 = arith.constant 0 : index
      %192 = vector.load %arg3[%191, %c22, %c0_48] : memref<3x25x128xf32, #tpu.memory_space<vmem>>, vector<1x1x128xf32>
      %193 = vector.shape_cast %192 : vector<1x1x128xf32> to vector<1x128xf32>
      %194 = vector.broadcast %193 : vector<1x128xf32> to vector<16x128xf32>
      %195 = arith.mulf %37, %194 : vector<16x128xf32>
      %196 = arith.addf %190, %195 : vector<16x128xf32>
      %197 = arith.index_cast %arg5 : i32 to index
      %c23 = arith.constant 23 : index
      %c0_49 = arith.constant 0 : index
      %198 = vector.load %arg3[%197, %c23, %c0_49] : memref<3x25x128xf32, #tpu.memory_space<vmem>>, vector<1x1x128xf32>
      %199 = vector.shape_cast %198 : vector<1x1x128xf32> to vector<1x128xf32>
      %200 = vector.broadcast %199 : vector<1x128xf32> to vector<16x128xf32>
      %201 = arith.mulf %46, %200 : vector<16x128xf32>
      %202 = arith.addf %196, %201 : vector<16x128xf32>
      %203 = arith.index_cast %arg5 : i32 to index
      %c24 = arith.constant 24 : index
      %c0_50 = arith.constant 0 : index
      %204 = vector.load %arg3[%203, %c24, %c0_50] : memref<3x25x128xf32, #tpu.memory_space<vmem>>, vector<1x1x128xf32>
      %205 = vector.shape_cast %204 : vector<1x1x128xf32> to vector<1x128xf32>
      %206 = vector.broadcast %205 : vector<1x128xf32> to vector<16x128xf32>
      %207 = arith.mulf %49, %206 : vector<16x128xf32>
      %208 = arith.addf %202, %207 : vector<16x128xf32>
      %c14_i32_51 = arith.constant 14 : i32
      %209 = tpu.dynamic_rotate %208 by %c14_i32_51 dim 0 : vector<16x128xf32>, i32 -> vector<16x128xf32>
      %cst_52 = arith.constant 0.000000e+00 : f32
      %210 = vector.broadcast %cst_52 : f32 to vector<16x128xf32>
      %211 = arith.select %33, %209, %210 : vector<16x128xi1>, vector<16x128xf32>
      %212 = arith.addf %179, %211 : vector<16x128xf32>
      %c0_53 = arith.constant 0 : index
      %213 = arith.index_cast %arg5 : i32 to index
      %c0_54 = arith.constant 0 : index
      %c0_55 = arith.constant 0 : index
      %214 = vector.load %arg4[%c0_53, %213, %c0_54, %c0_55] : memref<1x3x16x128xf32, #tpu.memory_space<vmem>>, vector<1x1x16x128xf32>
      %215 = vector.shape_cast %214 : vector<1x1x16x128xf32> to vector<16x128xf32>
      %216 = vector.shape_cast %212 : vector<16x128xf32> to vector<1x1x16x128xf32>
      tpu.vector_store %arg4[%c0_53, %213, %c0_54, %c0_55], %216 {strides = array<i32>} : memref<1x3x16x128xf32, #tpu.memory_space<vmem>>, vector<1x1x16x128xf32>,
    }
    %c3_i32_10 = arith.constant 3 : i32
    return
  }
  func.func @transform_0(%arg0: i32, %arg1: i32) -> (i32, i32, i32, i32) {
    %c0_i32 = arith.constant 0 : i32
    %c0_i32_0 = arith.constant 0 : i32
    %c0_i32_1 = arith.constant 0 : i32
    return %arg0, %arg1, %c0_i32, %c0_i32_0 : i32, i32, i32, i32
  }
  func.func @transform_1(%arg0: i32, %arg1: i32) -> (i32, i32, i32) {
    %c0_i32 = arith.constant 0 : i32
    %c0_i32_0 = arith.constant 0 : i32
    %c0_i32_1 = arith.constant 0 : i32
    return %arg1, %c0_i32, %c0_i32_0 : i32, i32, i32
  }
  func.func @transform_2(%arg0: i32, %arg1: i32) -> (i32, i32, i32, i32) {
    %c0_i32 = arith.constant 0 : i32
    %c0_i32_0 = arith.constant 0 : i32
    %c0_i32_1 = arith.constant 0 : i32
    return %arg0, %arg1, %c0_i32, %c0_i32_0 : i32, i32, i32, i32
  }
}

</mosaic_0001>

<bundles_post_ra>
// kernel: squeeze.9
= control target key start
LH: loop header
LB: loop body
LE: loop exit
PB: predicated region body
PF: predicated region fallthrough
CT: control target
= control target key end

     0   :  { %s268_s10 = smov 120   ;;  %s269_s15 = smov 112   ;;  %vm3_vm0 = vcmask 64512   ;;  %s502_s0 = inlined_call_operand.vmem [shape: f32[48,5,5], index: 0, kind: input, shape index: {}]   ;;  %s503_s1 = inlined_call_operand.vmem [shape: f32[6,8,25], index: 1, kind: output, shape index: {}]  }
   0x1   :  { %v218_v0 = vld.sshfl [vmem:[%s502_s0 + $0x19] sm:$0xff pattern:$0xa9873210]   ;;  %v221_v2 = vld [vmem:[%s502_s0 + $0x24] sm:$0x1]   ;;  %s270_s18 = smov 104  }
   0x2   :  { %v35_v1 = vld.sshfl [vmem:[%s502_s0] sm:$0xff pattern:$0xa9843210]   ;;  %54 = vrot.lane.b32.xlu1 %v218_v0, %s268_s10  ;;  %v215_v3 = vld.sshfl [vmem:[%s502_s0 + $0xb] sm:$0xff pattern:$0xd9876510]  }
   0x3   :  { %36 = vrot.lane.b32.xlu0 %v35_v1, %s268_s10  ;;  %v231_v4 = vld [vmem:[%s502_s0 + $0x24] sm:$0x1]   ;;  %v201_v7 = vld [vmem:[%s502_s0 + $0x8] sm:$0x1f]   ;;  %v204_v8 = vld [vmem:[%s502_s0 + $0x10] sm:$0x1f]  }
   0x4   :  { %v241_v5 = vld [vmem:[%s502_s0 + $0x24] sm:$0x1]   ;;  %202 = vst.msk [vmem:[%s503_s1 + $0x28] ss:$8 sm:$0xf] %vm3_vm0, %v201_v7   ;;  %s271_s14 = smov 96  }
   0x5   :  { %v2_v6 = vld [vmem:[%s502_s0] sm:$0x1f]   ;;  %203 = vst.msk [vmem:[%s503_s1 + $0x44] sm:$0x10] %vm3_vm0, %v201_v7   ;;  %206 = vst.msk [vmem:[%s503_s1 + $0x6c] sm:$0x10] %vm3_vm0, %v204_v8  }
   0x6   :  { %63 = vrot.lane.b32.xlu1 %v221_v2, %s268_s10  ;;  %4 = vst.msk [vmem:[%s503_s1] ss:$8 sm:$0xf] %vm3_vm0, %v2_v6   ;;  %200 = vst.msk [vmem:[%s503_s1 + $0x1c] sm:$0x10] %vm3_vm0, %v2_v6   ;;  %s272_s25 = smov 88  }
   0x7   :  { %45 = vrot.lane.b32.xlu0 %v215_v3, %s268_s10  ;;  %205 = vst.msk [vmem:[%s503_s1 + $0x50] ss:$8 sm:$0xf] %vm3_vm0, %v204_v8   ;;  %v207_v9 = vld [vmem:[%s502_s0 + $0x18] sm:$0x1f]  }
   0x8   :  { %v210_v10 = vld [vmem:[%s502_s0 + $0x20] sm:$0x1f]   ;;  %208 = vst.msk [vmem:[%s503_s1 + $0x78] ss:$8 sm:$0xf] %vm3_vm0, %v207_v9  }
   0x9   :  { %209 = vst.msk [vmem:[%s503_s1 + $0x94] sm:$0x10] %vm3_vm0, %v207_v9   ;;  %211 = vst.msk [vmem:[%s503_s1 + $0xa0] ss:$8 sm:$0xf] %vm3_vm0, %v210_v10  }
   0xa   :  { %78 = vrot.lane.b32.xlu1 %v215_v3, %s269_s15  ;;  %212 = vst.msk [vmem:[%s503_s1 + $0xbc] sm:$0x10] %vm3_vm0, %v210_v10   ;;  %v251_v11 = vld [vmem:[%s502_s0 + $0x24] sm:$0x1]  }
   0xb   :  { %69 = vrot.lane.b32.xlu0 %v35_v1, %s269_s15  ;;  %v261_v12 = vld [vmem:[%s502_s0 + $0x24] sm:$0x1]  }
   0xe   :  { %96 = vrot.lane.b32.xlu1 %v231_v4, %s269_s15 }
   0xf   :  { %87 = vrot.lane.b32.xlu0 %v218_v0, %s269_s15 }
  0x12   :  { %111 = vrot.lane.b32.xlu1 %v215_v3, %s270_s18 }
  0x13   :  { %102 = vrot.lane.b32.xlu0 %v35_v1, %s270_s18 }
  0x16   :  { %129 = vrot.lane.b32.xlu1 %v241_v5, %s270_s18 }
  0x17   :  { %120 = vrot.lane.b32.xlu0 %v218_v0, %s270_s18 }
  0x1a   :  { %144 = vrot.lane.b32.xlu1 %v215_v3, %s271_s14 }
  0x1b   :  { %135 = vrot.lane.b32.xlu0 %v35_v1, %s271_s14 }
  0x1e   :  { %162 = vrot.lane.b32.xlu1 %v251_v11, %s271_s14 }
  0x1f   :  { %153 = vrot.lane.b32.xlu0 %v218_v0, %s271_s14 }
  0x22   :  { %177 = vrot.lane.b32.xlu1 %v215_v3, %s272_s25 }
  0x23   :  { %168 = vrot.lane.b32.xlu0 %v35_v1, %s272_s25 }
  0x26   :  { %195 = vrot.lane.b32.xlu1 %v261_v12, %s272_s25 }
  0x27   :  { %186 = vrot.lane.b32.xlu0 %v218_v0, %s272_s25 }
  0x74   :  { %v55_v13 = vpop.permute.xlu1 %54  }
  0x75   :  { %v37_v14 = vpop.permute.xlu0 %36   ;;  %219 = vst.msk [vmem:[%s503_s1 + $0x81] ss:$8 sm:$0xf] %vm3_vm0, %v55_v13   ;;  %220 = vst.msk [vmem:[%s503_s1 + $0x81] ss:$8 sm:$0xf0] %vm3_vm0, %v55_v13  }
  0x76   :  { %213 = vst.msk [vmem:[%s503_s1 + $0x1] ss:$8 sm:$0xf] %vm3_vm0, %v37_v14   ;;  %214 = vst.msk [vmem:[%s503_s1 + $0x1] ss:$8 sm:$0xf0] %vm3_vm0, %v37_v14  }
  0x78   :  { %v64_v15 = vpop.permute.xlu1 %63  }
  0x79   :  { %v46_v16 = vpop.permute.xlu0 %45   ;;  %222 = vst.msk [vmem:[%s503_s1 + $0xc1] sm:$0x1] %vm3_vm0, %v64_v15  }
  0x7a   :  { %216 = vst.msk [vmem:[%s503_s1 + $0x41] ss:$8 sm:$0xf] %vm3_vm0, %v46_v16   ;;  %217 = vst.msk [vmem:[%s503_s1 + $0x41] ss:$8 sm:$0xf0] %vm3_vm0, %v46_v16  }
  0x7c   :  { %v79_v17 = vpop.permute.xlu1 %78  }
  0x7d   :  { %v70_v18 = vpop.permute.xlu0 %69   ;;  %226 = vst.msk [vmem:[%s503_s1 + $0x42] ss:$8 sm:$0xf] %vm3_vm0, %v79_v17   ;;  %227 = vst.msk [vmem:[%s503_s1 + $0x42] ss:$8 sm:$0xf0] %vm3_vm0, %v79_v17  }
  0x7e   :  { %223 = vst.msk [vmem:[%s503_s1 + $0x2] ss:$8 sm:$0xf] %vm3_vm0, %v70_v18   ;;  %224 = vst.msk [vmem:[%s503_s1 + $0x2] ss:$8 sm:$0xf0] %vm3_vm0, %v70_v18  }
  0x80   :  { %v97_v19 = vpop.permute.xlu1 %96  }
  0x81   :  { %v88_v20 = vpop.permute.xlu0 %87   ;;  %232 = vst.msk [vmem:[%s503_s1 + $0xc2] sm:$0x1] %vm3_vm0, %v97_v19  }
  0x82   :  { %229 = vst.msk [vmem:[%s503_s1 + $0x82] ss:$8 sm:$0xf] %vm3_vm0, %v88_v20   ;;  %230 = vst.msk [vmem:[%s503_s1 + $0x82] ss:$8 sm:$0xf0] %vm3_vm0, %v88_v20  }
  0x84   :  { %v112_v21 = vpop.permute.xlu1 %111  }
  0x85   :  { %v103_v22 = vpop.permute.xlu0 %102   ;;  %236 = vst.msk [vmem:[%s503_s1 + $0x43] ss:$8 sm:$0xf] %vm3_vm0, %v112_v21   ;;  %237 = vst.msk [vmem:[%s503_s1 + $0x43] ss:$8 sm:$0xf0] %vm3_vm0, %v112_v21  }
  0x86   :  { %233 = vst.msk [vmem:[%s503_s1 + $0x3] ss:$8 sm:$0xf] %vm3_vm0, %v103_v22   ;;  %234 = vst.msk [vmem:[%s503_s1 + $0x3] ss:$8 sm:$0xf0] %vm3_vm0, %v103_v22  }
  0x88   :  { %v130_v23 = vpop.permute.xlu1 %129  }
  0x89   :  { %v121_v24 = vpop.permute.xlu0 %120   ;;  %242 = vst.msk [vmem:[%s503_s1 + $0xc3] sm:$0x1] %vm3_vm0, %v130_v23  }
  0x8a   :  { %239 = vst.msk [vmem:[%s503_s1 + $0x83] ss:$8 sm:$0xf] %vm3_vm0, %v121_v24   ;;  %240 = vst.msk [vmem:[%s503_s1 + $0x83] ss:$8 sm:$0xf0] %vm3_vm0, %v121_v24  }
  0x8c   :  { %v145_v25 = vpop.permute.xlu1 %144  }
  0x8d   :  { %v136_v26 = vpop.permute.xlu0 %135   ;;  %246 = vst.msk [vmem:[%s503_s1 + $0x44] ss:$8 sm:$0xf] %vm3_vm0, %v145_v25   ;;  %247 = vst.msk [vmem:[%s503_s1 + $0x44] ss:$8 sm:$0xf0] %vm3_vm0, %v145_v25  }
  0x8e   :  { %243 = vst.msk [vmem:[%s503_s1 + $0x4] ss:$8 sm:$0xf] %vm3_vm0, %v136_v26   ;;  %244 = vst.msk [vmem:[%s503_s1 + $0x4] ss:$8 sm:$0xf0] %vm3_vm0, %v136_v26  }
  0x90   :  { %v163_v27 = vpop.permute.xlu1 %162  }
  0x91   :  { %v154_v28 = vpop.permute.xlu0 %153   ;;  %252 = vst.msk [vmem:[%s503_s1 + $0xc4] sm:$0x1] %vm3_vm0, %v163_v27  }
  0x92   :  { %249 = vst.msk [vmem:[%s503_s1 + $0x84] ss:$8 sm:$0xf] %vm3_vm0, %v154_v28   ;;  %250 = vst.msk [vmem:[%s503_s1 + $0x84] ss:$8 sm:$0xf0] %vm3_vm0, %v154_v28  }
  0x94   :  { %v178_v29 = vpop.permute.xlu1 %177  }
  0x95   :  { %v169_v30 = vpop.permute.xlu0 %168   ;;  %256 = vst.msk [vmem:[%s503_s1 + $0x45] ss:$8 sm:$0xf] %vm3_vm0, %v178_v29   ;;  %257 = vst.msk [vmem:[%s503_s1 + $0x45] ss:$8 sm:$0xf0] %vm3_vm0, %v178_v29  }
  0x96   :  { %253 = vst.msk [vmem:[%s503_s1 + $0x5] ss:$8 sm:$0xf] %vm3_vm0, %v169_v30   ;;  %254 = vst.msk [vmem:[%s503_s1 + $0x5] ss:$8 sm:$0xf0] %vm3_vm0, %v169_v30  }
  0x98   :  { %v196_v31 = vpop.permute.xlu1 %195  }
  0x99   :  { %v187_v32 = vpop.permute.xlu0 %186   ;;  %262 = vst.msk [vmem:[%s503_s1 + $0xc5] sm:$0x1] %vm3_vm0, %v196_v31  }
  0x9a   :  { %259 = vst.msk [vmem:[%s503_s1 + $0x85] ss:$8 sm:$0xf] %vm3_vm0, %v187_v32   ;;  %260 = vst.msk [vmem:[%s503_s1 + $0x85] ss:$8 sm:$0xf0] %vm3_vm0, %v187_v32  }

// kernel: omnishift_forward.1
= control target key start
LH: loop header
LB: loop body
LE: loop exit
PB: predicated region body
PF: predicated region fallthrough
CT: control target
= control target key end

     0   :  { %s817_s9 = smov 0   ;;  %s819_s10 = smov 0   ;;  %s998_s0 = inlined_call_operand.vmem [shape: f32[2,6,16,128], index: 0, kind: input, shape index: {}]   ;;  %s999_s1 = inlined_call_operand.vmem [shape: f32[6,25,128], index: 1, kind: input, shape index: {}]   ;;  %s1000_s2 = inlined_call_operand.vmem [shape: f32[2,6,16,128], index: 2, kind: output, shape index: {}]  }
   0x1   :  { %s821_s11 = smov 0   ;;  %s823_s12 = smov 0  }
   0x2   :  { %s825_s13 = smov 0  }
   0x3 LB: > { %s21_s14 = sadd.s32 1, %s784_s11  ;;  %s24_s15 = sadd.s32 1, %s788_s12  ;;  %s792_s13 = sphi %s825_s13, %s12_s13   ;;  %s788_s12 = sphi %s823_s12, %s1004_s12   ;;  %s784_s11 = sphi %s821_s11, %s1003_s11   ;;  %s780_s10 = sphi %s819_s10, %s1002_s10   ;;  %s776_s9 = sphi %s817_s9, %s1001_s9  }
   0x4   : > { %p22_p0 = scmp.ge.s32.totalorder %s21_s14, 2  ;;  %p660_p1 = scmp.ge.s32.totalorder %s792_s13, 1 }
   0x5   : > { %p146_p2 = scmp.lt.s32.totalorder %s792_s13, 5 }
   0x6   : > { %s1006_s14 = smov (%p22_p0, %s21_s14), 0  ;;  %s1008_s15 = smov (!%p22_p0, %s24_s15), %s788_s12 }
   0x7   : > { %p147_p3 = pnand %p660_p1, %p146_p2  ;;  %p26_p4 = scmp.ge.s32.totalorder %s1008_s15, 2 }
   0x8   : > { %s184_s16 = smul.u32 (!%p147_p3), 3, %s776_s9  ;;  %p185_p5 = scmp.lt.s32.totalorder (!%p147_p3), %s780_s10, 1 }
   0x9   : > { %s1010_s15 = smov (%p26_p4, %s1008_s15), 0  ;;  %150 = sbr.rel (%p147_p3) target bundleno = 178 (0xb2), region = 28 }
   0xa   : > { %p187_p6 = scmp.lt.s32.totalorder (!%p147_p3), %s184_s16, 5  ;;  %s877_s3 = smov (!%p147_p3), 0  }
   0xe   : > { %v213_v0 = vlaneseq  ;;  %s1012_s10 = smov (!%p185_p5, %s780_s10), 1  ;;  %s1014_s16 = smov (!%p187_p6, %s184_s16), 5 }
   0xf   : > { %s697_s17 = smul.u32 12, %s1012_s10  ;;  %s661_s18 = sshll.u32 %s1014_s16, 1 }
  0x10   : > { %v214_v1 = vand.u32 127, %v213_v0  ;;  %v847_v2 = vshrl.u32 %v213_v0, 7  ;;  %s696_s19 = sshll.u32 %s1014_s16, 5 }
  0x11   : > { %s191_s20 = sadd.s32 %s697_s17, %s661_s18  ;;  %s865_s23 = scalar_lea.vmem %s999_s1, %s696_s19 }
  0x12   : > { %v849_v3 = vand.u32 15, %v214_v1  ;;  %v852_v4 = vadd.s32 8, %v847_v2  ;;  %vm234_vm0 = vcmp.ge.s32.totalorder %v847_v2, 2  ;;  %vm236_vm1 = vcmp.ge.s32.totalorder %v847_v2, 1  ;;  %s662_s24 = sshll.u32 %s191_s20, 3 }
  0x13   : > { %s870_s27 = scalar_lea.vmem %s998_s0, %s662_s24  ;;  %s875_s30 = scalar_lea.vmem %s1000_s2, %s662_s24 }
  0x14   : > { %vm230_vm2 = vcmp.ge.s32.totalorder %v849_v3, 2  ;;  %vm231_vm3 = vcmp.ge.s32.totalorder %v849_v3, 1  ;;  %vm232_vm4 = vcmp.lt.s32.totalorder %v849_v3, 15  ;;  %vm233_vm5 = vcmp.lt.s32.totalorder %v849_v3, 14 }
  0x15   : > { %vm239_vm6 = vcmp.lt.s32.totalorder %v852_v4, 15  ;;  %vm241_vm7 = vcmp.lt.s32.totalorder %v852_v4, 14 }
  0x16 LB: >> { %s667_s4 = sshll.u32 %s796_s3, 4  ;;  %s668_s6 = sshll.u32 %s796_s3, 5  ;;  %vm323_vm8 = vcmp.lt.s32.totalorder %v847_v2, 2  ;;  %vm375_vm9 = vcmp.lt.s32.totalorder %v847_v2, 1  ;;  %vm472_vm10 = vcmp.lt.s32.totalorder %v847_v2, 7  ;;  %vm524_vm11 = vcmp.lt.s32.totalorder %v847_v2, 6  ;;  %s796_s3 = sphi %s877_s3, %s247_s3  }
  0x17   : >> { %s249_s5 = scalar_lea.vmem %s870_s27, %s667_s4  ;;  %s798_s7 = smov 1  }
  0x18   : >> { %v250_v5 = vld [vmem:[%s249_s5] sm:$0xff]  ;;  %s799_s8 = smov 2   ;;  %v251_v6 = vld [vmem:[%s249_s5 + $0x8] sm:$0xff]  ;;  %s888_s9 = scalar_lea.vmem %s865_s23, %s668_s6 }
  0x19   : >> { %258 = vrot.lane.b32.xlu1 %v250_v5, %s798_s7  ;;  %252 = vrot.lane.b32.xlu0 %v250_v5, %s799_s8  ;;  %v671_v7 = vld [vmem:[%s888_s9 + $0x2] ss:$0 sm:$0xff]  ;;  %v676_v9 = vld [vmem:[%s888_s9 + $0x7] ss:$0 sm:$0xff]  ;;  %s800_s10 = smov 127   ;;  %s801_s16 = smov 126  }
  0x1a   : >> { %v891_v8 = vmul.f32 %v671_v7, %v251_v6  ;;  %v894_v10 = vmul.f32 %v671_v7, %v250_v5  ;;  %v896_v11 = vmul.f32 %v676_v9, %v251_v6  ;;  %v681_v12 = vld [vmem:[%s888_s9 + $0xc] ss:$0 sm:$0xff]  ;;  %v686_v13 = vld [vmem:[%s888_s9 + $0x11] ss:$0 sm:$0xff]  ;;  %v900_v14 = vmul.f32 %v676_v9, %v250_v5  ;;  %v691_v17 = vld [vmem:[%s888_s9 + $0x16] ss:$0 sm:$0xff]  ;;  %s531_s17 = scalar_lea.vmem %s875_s30, %s667_s4 }
  0x1b   : >> { %v902_v15 = vmul.f32 %v681_v12, %v251_v6  ;;  %v904_v16 = vmul.f32 %v686_v13, %v251_v6  ;;  %v907_v18 = vmul.f32 %v681_v12, %v250_v5  ;;  %v909_v19 = vmul.f32 %v686_v13, %v250_v5  ;;  %v670_v22 = vld [vmem:[%s888_s9 + $0x1] ss:$0 sm:$0xff]  ;;  %v675_v23 = vld [vmem:[%s888_s9 + $0x6] ss:$0 sm:$0xff]  ;;  %v680_v24 = vld [vmem:[%s888_s9 + $0xb] ss:$0 sm:$0xff] }
  0x1c   : >> { %v911_v20 = vmul.f32 %v691_v17, %v251_v6  ;;  %v913_v21 = vmul.f32 %v691_v17, %v250_v5  ;;  %v685_v25 = vld [vmem:[%s888_s9 + $0x10] ss:$0 sm:$0xff]  ;;  %v690_v26 = vld [vmem:[%s888_s9 + $0x15] ss:$0 sm:$0xff]  ;;  %v669_v28 = vld [vmem:[%s888_s9] ss:$0 sm:$0xff] }
  0x1d   : >> { %260 = vrot.lane.b32.xlu1 %v251_v6, %s798_s7  ;;  %254 = vrot.lane.b32.xlu0 %v251_v6, %s799_s8  ;;  %v674_v29 = vld [vmem:[%s888_s9 + $0x5] ss:$0 sm:$0xff]  ;;  %v679_v30 = vld [vmem:[%s888_s9 + $0xa] ss:$0 sm:$0xff]  ;;  %s247_s3 = sadd.s32 1, %s796_s3  }
  0x1e   : >> { %v684_v33 = vld [vmem:[%s888_s9 + $0xf] ss:$0 sm:$0xff]  ;;  %v689_v34 = vld [vmem:[%s888_s9 + $0x14] ss:$0 sm:$0xff]  ;;  %v672_v0 = vld [vmem:[%s888_s9 + $0x3] ss:$0 sm:$0xff] }
  0x1f   : >> { %v677_v1 = vld [vmem:[%s888_s9 + $0x8] ss:$0 sm:$0xff]  ;;  %p244_p7 = scmp.ge.s32.totalorder %s247_s3, 3  }
  0x21   : >> { %266 = vrot.lane.b32.xlu1 %v251_v6, %s800_s10  ;;  %264 = vrot.lane.b32.xlu0 %v250_v5, %s800_s10 }
  0x25   : >> { %272 = vrot.lane.b32.xlu1 %v251_v6, %s801_s16  ;;  %270 = vrot.lane.b32.xlu0 %v250_v5, %s801_s16  ;;  %v682_v5 = vld [vmem:[%s888_s9 + $0xd] ss:$0 sm:$0xff] }
  0x8b   : >> { %v259_v27 = vpop.permute.xlu1 %258  ;;  %v253_v31 = vpop.permute.xlu0 %252 }
  0x8c   : >> { %v262_v32 = vsel %vm231_vm3, %v259_v27, 0.0  ;;  %v256_v35 = vsel %vm230_vm2, %v253_v31, 0.0  ;;  %v692_v27 = vld [vmem:[%s888_s9 + $0x17] ss:$0 sm:$0xff] }
  0x8d   : >> { %v290_v36 = vmul.f32 %v670_v22, %v262_v32  ;;  %v342_v37 = vmul.f32 %v675_v23, %v262_v32  ;;  %v394_v38 = vmul.f32 %v680_v24, %v262_v32  ;;  %v439_v39 = vmul.f32 %v685_v25, %v262_v32 }
  0x8e   : >> { %v491_v40 = vmul.f32 %v690_v26, %v262_v32  ;;  %v283_v41 = vmul.f32 %v669_v28, %v256_v35  ;;  %v335_v42 = vmul.f32 %v674_v29, %v256_v35  ;;  %v387_v43 = vmul.f32 %v679_v30, %v256_v35 }
  0x8f   : >> { %v432_v44 = vmul.f32 %v684_v33, %v256_v35  ;;  %v484_v45 = vmul.f32 %v689_v34, %v256_v35  ;;  %v261_v46 = vpop.permute.xlu1 %260  ;;  %v255_v47 = vpop.permute.xlu0 %254 }
  0x90   : >> { %v292_v48 = vadd.f32 %v290_v36, %v283_v41  ;;  %v344_v49 = vadd.f32 %v342_v37, %v335_v42  ;;  %v396_v50 = vadd.f32 %v394_v38, %v387_v43  ;;  %v263_v51 = vsel %vm231_vm3, %v261_v46, 0.0 }
  0x91   : >> { %v441_v52 = vadd.f32 %v439_v39, %v432_v44  ;;  %v493_v53 = vadd.f32 %v491_v40, %v484_v45  ;;  %v291_v54 = vmul.f32 %v670_v22, %v263_v51  ;;  %v343_v55 = vmul.f32 %v675_v23, %v263_v51  ;;  %v673_v45 = vld [vmem:[%s888_s9 + $0x4] ss:$0 sm:$0xff] }
  0x92   : >> { %v395_v56 = vmul.f32 %v680_v24, %v263_v51  ;;  %v440_v57 = vmul.f32 %v685_v25, %v263_v51  ;;  %v492_v58 = vmul.f32 %v690_v26, %v263_v51  ;;  %v257_v59 = vsel %vm230_vm2, %v255_v47, 0.0  ;;  %v687_v26 = vld [vmem:[%s888_s9 + $0x12] ss:$0 sm:$0xff]  ;;  %v683_v51 = vld [vmem:[%s888_s9 + $0xe] ss:$0 sm:$0xff] }
  0x93   : >> { %v284_v60 = vmul.f32 %v669_v28, %v257_v59  ;;  %v336_v61 = vmul.f32 %v674_v29, %v257_v59  ;;  %v388_v62 = vmul.f32 %v679_v30, %v257_v59  ;;  %v433_v63 = vmul.f32 %v684_v33, %v257_v59  ;;  %v267_v6 = vpop.permute.xlu1 %266  ;;  %v265_v7 = vpop.permute.xlu0 %264 }
  0x94   : >> { %v485_v9 = vmul.f32 %v689_v34, %v257_v59  ;;  %v269_v12 = vsel %vm232_vm4, %v267_v6, 0.0  ;;  %v268_v13 = vsel %vm232_vm4, %v265_v7, 0.0  ;;  %v301_v17 = vadd.f32 %v894_v10, %v292_v48 }
  0x95   : >> { %v293_v22 = vadd.f32 %v291_v54, %v284_v60  ;;  %v345_v23 = vadd.f32 %v343_v55, %v336_v61  ;;  %v397_v24 = vadd.f32 %v395_v56, %v388_v62  ;;  %v442_v25 = vadd.f32 %v440_v57, %v433_v63  ;;  %v688_v54 = vld [vmem:[%s888_s9 + $0x13] ss:$0 sm:$0xff]  ;;  %v693_v55 = vld [vmem:[%s888_s9 + $0x18] ss:$0 sm:$0xff] }
  0x96   : >> { %v494_v28 = vadd.f32 %v492_v58, %v485_v9  ;;  %v309_v29 = vmul.f32 %v672_v0, %v269_v12  ;;  %v361_v30 = vmul.f32 %v677_v1, %v269_v12  ;;  %v413_v31 = vmul.f32 %v682_v5, %v269_v12 }
  0x97   : >> { %v302_v32 = vadd.f32 %v891_v8, %v293_v22  ;;  %v354_v33 = vadd.f32 %v896_v11, %v345_v23  ;;  %v406_v34 = vadd.f32 %v902_v15, %v397_v24  ;;  %v451_v10 = vadd.f32 %v904_v16, %v442_v25  ;;  %v273_v11 = vpop.permute.xlu1 %272  ;;  %v678_v16 = vld [vmem:[%s888_s9 + $0x9] ss:$0 sm:$0xff]  ;;  %v271_v58 = vpop.permute.xlu0 %270 }
  0x98   : >> { %v458_v35 = vmul.f32 %v687_v26, %v269_v12  ;;  %v503_v36 = vadd.f32 %v911_v20, %v494_v28  ;;  %v510_v37 = vmul.f32 %v692_v27, %v269_v12  ;;  %v308_v38 = vmul.f32 %v672_v0, %v268_v13 }
  0x99   : >> { %v311_v39 = vadd.f32 %v309_v29, %v302_v32  ;;  %v363_v40 = vadd.f32 %v361_v30, %v354_v33  ;;  %v415_v41 = vadd.f32 %v413_v31, %v406_v34  ;;  %v353_v8 = vadd.f32 %v900_v14, %v344_v49 }
  0x9a   : >> { %v460_v42 = vadd.f32 %v458_v35, %v451_v10  ;;  %v512_v43 = vadd.f32 %v510_v37, %v503_v36  ;;  %v310_v15 = vadd.f32 %v308_v38, %v301_v17  ;;  %v360_v44 = vmul.f32 %v677_v1, %v268_v13 }
  0x9b   : >> { %v405_v46 = vadd.f32 %v907_v18, %v396_v50  ;;  %v412_v20 = vmul.f32 %v682_v5, %v268_v13  ;;  %v450_v47 = vadd.f32 %v909_v19, %v441_v52  ;;  %v457_v48 = vmul.f32 %v687_v26, %v268_v13 }
  0x9c   : >> { %v362_v56 = vadd.f32 %v360_v44, %v353_v8  ;;  %v502_v57 = vadd.f32 %v913_v21, %v493_v53  ;;  %v509_v14 = vmul.f32 %v692_v27, %v268_v13  ;;  %v275_v49 = vsel %vm233_vm5, %v273_v11, 0.0 }
  0x9d   : >> { %v414_v59 = vadd.f32 %v412_v20, %v405_v46  ;;  %v459_v60 = vadd.f32 %v457_v48, %v450_v47  ;;  %v318_v61 = vmul.f32 %v673_v45, %v275_v49  ;;  %v370_v62 = vmul.f32 %v678_v16, %v275_v49 }
  0x9e   : >> { %v511_v18 = vadd.f32 %v509_v14, %v502_v57  ;;  %v422_v50 = vmul.f32 %v683_v51, %v275_v49  ;;  %v467_v63 = vmul.f32 %v688_v54, %v275_v49  ;;  %v519_v19 = vmul.f32 %v693_v55, %v275_v49 }
  0x9f   : >> { %v320_v52 = vadd.f32 %v318_v61, %v311_v39  ;;  %v372_v0 = vadd.f32 %v370_v62, %v363_v40  ;;  %v274_v1 = vsel %vm233_vm5, %v271_v58, 0.0 }
  0xa0   : >> { %v424_v5 = vadd.f32 %v422_v50, %v415_v41  ;;  %v469_v21 = vadd.f32 %v467_v63, %v460_v42  ;;  %v521_v53 = vadd.f32 %v519_v19, %v512_v43  ;;  %v317_v6 = vmul.f32 %v673_v45, %v274_v1 }
  0xa1   : >> { %v369_v7 = vmul.f32 %v678_v16, %v274_v1  ;;  %v421_v9 = vmul.f32 %v683_v51, %v274_v1  ;;  %v322_v12 = vrot.slane %v320_v52, 6  ;;  %v466_v17 = vmul.f32 %v688_v54, %v274_v1 }
  0xa2   : >> { %v319_v13 = vadd.f32 %v317_v6, %v310_v15  ;;  %v374_v22 = vrot.slane %v372_v0, 7  ;;  %v518_v25 = vmul.f32 %v693_v55, %v274_v1  ;;  %v471_v26 = vrot.slane %v469_v21, 1 }
  0xa3   : >> { %v371_v23 = vadd.f32 %v369_v7, %v362_v56  ;;  %v423_v24 = vadd.f32 %v421_v9, %v414_v59  ;;  %v468_v28 = vadd.f32 %v466_v17, %v459_v60  ;;  %v523_v29 = vrot.slane %v521_v53, 2 }
  0xa4   : >> { %v321_v27 = vrot.slane %v319_v13, 6  ;;  %v520_v31 = vadd.f32 %v518_v25, %v511_v18 }
  0xa5   : >> { %v373_v30 = vrot.slane %v371_v23, 7  ;;  %v470_v34 = vrot.slane %v468_v28, 1 }
  0xa6   : >> { %v324_v32 = vsel %vm323_vm8, %v321_v27, %v322_v12  ;;  %v325_v33 = vsel %vm323_vm8, %v322_v12, %v321_v27  ;;  %v522_v37 = vrot.slane %v520_v31, 2 }
  0xa7   : >> { %v326_v10 = vsel %vm234_vm0, %v325_v33, 0.0  ;;  %v376_v35 = vsel %vm375_vm9, %v373_v30, %v374_v22  ;;  %v377_v36 = vsel %vm375_vm9, %v374_v22, %v373_v30  ;;  %v473_v40 = vsel %vm472_vm10, %v470_v34, %v471_v26 }
  0xa8   : >> { %v378_v38 = vsel %vm236_vm1, %v377_v36, 0.0  ;;  %v381_v39 = vadd.f32 %v376_v35, %v324_v32  ;;  %v474_v41 = vsel %vm472_vm10, %v471_v26, %v470_v34  ;;  %v525_v11 = vsel %vm524_vm11, %v522_v37, %v523_v29 }
  0xa9   : >> { %v380_v8 = vadd.f32 %v378_v38, %v326_v10  ;;  %v526_v42 = vsel %vm524_vm11, %v523_v29, %v522_v37  ;;  %v476_v44 = vsel %vm239_vm6, %v474_v41, 0.0 }
  0xaa   : >> { %v426_v43 = vadd.f32 %v424_v5, %v381_v39  ;;  %v528_v46 = vsel %vm241_vm7, %v526_v42, 0.0 }
  0xab   : >> { %v425_v15 = vadd.f32 %v423_v24, %v380_v8 }
  0xac   : >> { %v478_v45 = vadd.f32 %v476_v44, %v426_v43 }
  0xad   : >> { %v477_v16 = vadd.f32 %v473_v40, %v425_v15  ;;  %246 = sbr.rel (!%p244_p7) target bundleno = 22 (0x16), region = 71 }
  0xae   : >> { %v530_v20 = vadd.f32 %v528_v46, %v478_v45 }
  0xaf   : >> { %v529_v47 = vadd.f32 %v525_v11, %v477_v16 }
  0xb0   : >> { %533 = vst [vmem:[%s531_s17 + $0x8] sm:$0xff] %v530_v20 }
  0xb1   : >> { %532 = vst [vmem:[%s531_s17] sm:$0xff] %v529_v47 }
  0xb2 PF: > { %s12_s13 = sadd.s32 1, %s792_s13   ;;  %s1001_s9 = smov %s784_s11 }
  0xb3   : > { %p9_p8 = scmp.ge.s32.totalorder %s12_s13, 6   ;;  %s1002_s10 = smov %s788_s12 }
  0xb4   : > { %s1003_s11 = smov %s1006_s14  ;;  %s1004_s12 = smov %s1010_s15 }
  0xb5   :  { %11 = sbr.rel (!%p9_p8) target bundleno = 3 (0x3), region = 82 }

</bundles_post_ra>
